<compile_context>
chip_gen: v5e
topology: v5e:2x2
jax: 0.10.0
libtpu: 0.0.40
codegen_flags: <defaults>
</compile_context>

<pallas_src>
import functools

import jax
import jax.numpy as jnp
from jax.experimental import pallas as pl
from jax.experimental.pallas import tpu as pltpu


def _patch_merge_kernel(x_ref, w_ref, shift_ref, o_ref):
    # x_ref:     (K, tHW)       bf16 patch columns, rows ordered (c, kh, kw)
    # w_ref:     (Cout_p, K)    bf16 conv weight with BN scale folded in
    # shift_ref: (Cout_p, 1)    f32 BN shift (beta - mean*scale)
    # o_ref:     (Cout_p, tHW)  output tile in the final dtype
    acc = jnp.dot(w_ref[...], x_ref[...], preferred_element_type=jnp.float32)
    o_ref[...] = (acc + shift_ref[...]).astype(o_ref.dtype)


def _round_up(x, m):
    return (x + m - 1) // m * m


def _pick_spatial_tile(hw, k, cout_p, out_bytes, budget_bytes):
    """Largest spatial tile (columns) that fits the VMEM budget.

    Returns (tile, padded_hw)."""
    w_bytes = 2 * cout_p * k * 2 + 2 * cout_p * 4        # double-buffered weight + shift
    per_col = 2 * (k * 2 + cout_p * out_bytes)           # double-buffered x + out per column
    cap = max(128, (budget_bytes - w_bytes) // per_col)
    if hw <= cap:
        return hw, hw                                     # one block along HW (full dim)
    # Largest multiple of 128 <= cap that divides hw: lane-dense, no padding copy.
    best = 0
    t = 128
    limit = min(cap, hw)
    while t <= limit:
        if hw % t == 0:
            best = t
        t += 128
    if best:
        return best, hw
    # Rare fallback: pad HW up to a multiple of the tile (extra columns sliced off later).
    thw = (cap // 128) * 128
    return thw, _round_up(hw, thw)


@functools.partial(jax.jit, static_argnames=("patch_size", "patch_stride"))
def patch_merging_forward(x, weight, gamma, beta, running_mean, running_var,
                          patch_size=2, patch_stride=2, eps=1e-5):
    """x: (N, C, H, W) NCHW. weight: (2C, C, kh, kw). Returns (N, 2C, Ho, Wo)."""
    assert patch_size == patch_stride, "PatchMerging uses kernel_size == stride"
    N, C, H, W = x.shape
    ph = pw = patch_size
    Ho, Wo = H // ph, W // pw
    HW = Ho * Wo
    Cout = weight.shape[0]                 # 2 * dim
    K = C * ph * pw
    out_dtype = x.dtype
    out_bytes = jnp.dtype(out_dtype).itemsize

    # ---- fold BatchNorm (eval) into the conv weight (host-side, one-time) ---------
    inv_std = jax.lax.rsqrt(running_var.astype(jnp.float32) + eps)
    scale = gamma.astype(jnp.float32) * inv_std                          # (Cout,)
    shift = beta.astype(jnp.float32) - running_mean.astype(jnp.float32) * scale
    wm = weight.reshape(Cout, K).astype(jnp.float32) * scale[:, None]    # (Cout, K)

    Cout_p = max(8, _round_up(Cout, 8))    # sublane alignment only (lanes = spatial dim)
    if Cout_p != Cout:
        wm = jnp.pad(wm, ((0, Cout_p - Cout), (0, 0)))
        shift = jnp.pad(shift, (0, Cout_p - Cout))
    wm = wm.astype(jnp.bfloat16)
    shift = shift.reshape(Cout_p, 1)

    # ---- activation prep: de-interleave 2x2 patches (single bf16 pass over x) -----
    # Rows ordered (c, kh, kw) to match the PyTorch OIHW weight flattening.
    x6 = x.astype(jnp.bfloat16).reshape(N, C, Ho, ph, Wo, pw)
    xt = jnp.transpose(x6, (0, 1, 3, 5, 2, 4)).reshape(N, K, HW)         # (N, K, Ho*Wo)

    # ---- tiling / VMEM budget ------------------------------------------------------
    budget = 40 * 1024 * 1024              # conservative for v7x's 64 MiB physical VMEM
    thw, HWp = _pick_spatial_tile(HW, K, Cout_p, out_bytes, budget)
    if HWp != HW:
        xt = jnp.pad(xt, ((0, 0), (0, 0), (0, HWp - HW)))

    need = 2 * Cout_p * K * 2 + 2 * thw * (K * 2 + Cout_p * out_bytes) + 4 * Cout_p
    vmem_limit = int(min(64 * 1024 * 1024, max(2 * need, 16 * 1024 * 1024)))

    grid = (N, HWp // thw)
    cost = pl.CostEstimate(
        flops=2 * N * HWp * K * Cout_p,
        transcendentals=0,
        bytes_accessed=N * K * HWp * 2 + Cout_p * K * 2 + N * Cout_p * HWp * out_bytes,
    )

    out = pl.pallas_call(
        _patch_merge_kernel,
        out_shape=jax.ShapeDtypeStruct((N, Cout_p, HWp), out_dtype),
        grid_spec=pltpu.PrefetchScalarGridSpec(
            num_scalar_prefetch=0,
            grid=grid,
            in_specs=[
                pl.BlockSpec((None, K, thw), lambda n, j: (n, 0, j)),   # activations
                pl.BlockSpec((Cout_p, K), lambda n, j: (0, 0)),         # scaled weight (resident)
                pl.BlockSpec((Cout_p, 1), lambda n, j: (0, 0)),         # BN shift
            ],
            out_specs=pl.BlockSpec((None, Cout_p, thw), lambda n, j: (n, 0, j)),
        ),
        compiler_params=pltpu.CompilerParams(
            dimension_semantics=("parallel", "parallel"),
            vmem_limit_bytes=vmem_limit,
        ),
        cost_estimate=cost,
    )(xt, wm, shift)

    if Cout_p != Cout or HWp != HW:
        out = out[:, :Cout, :HW]
    return out.reshape(N, Cout, Ho, Wo)                                  # already NCHW


def _reference(x, weight, gamma, beta, running_mean, running_var,
               patch_size=2, patch_stride=2, eps=1e-5):
    # Pure-JAX f32 reference: strided conv (NCHW) + BatchNorm2d eval.
    y = jax.lax.conv_general_dilated(
        x.astype(jnp.float32), weight.astype(jnp.float32),
        window_strides=(patch_stride, patch_stride), padding="VALID",
        dimension_numbers=("NCHW", "OIHW", "NCHW"))
    inv_std = 1.0 / jnp.sqrt(running_var + eps)
    scale = (gamma * inv_std)[None, :, None, None]
    shift = (beta - running_mean * gamma * inv_std)[None, :, None, None]
    return y * scale + shift


if __name__ == "__main__":
    # Module config: PatchMerging(patch_size2=2, patch_stride2=2, dim=4, norm_layer=BatchNorm2d)
    dim = 4
    patch_size2 = 2
    patch_stride2 = 2
    N, H, W = 2, 16, 16

    key = jax.random.PRNGKey(0)
    kx, kw, kg, kb, km, kv = jax.random.split(key, 6)

    x = jax.random.normal(kx, (N, dim, H, W), dtype=jnp.float32)

    # Conv2d(dim, 2*dim, k=2, s=2, bias=False) weight: (2*dim, dim, 2, 2)
    weight = 0.1 * jax.random.normal(kw, (2 * dim, dim, patch_size2, patch_size2),
                                     dtype=jnp.float32)
    # BatchNorm2d(2*dim) eval-mode parameters / running stats
    gamma = 1.0 + 0.1 * jax.random.normal(kg, (2 * dim,), dtype=jnp.float32)
    beta = 0.1 * jax.random.normal(kb, (2 * dim,), dtype=jnp.float32)
    running_mean = 0.1 * jax.random.normal(km, (2 * dim,), dtype=jnp.float32)
    running_var = jax.random.uniform(kv, (2 * dim,), minval=0.5, maxval=1.5,
                                     dtype=jnp.float32)

    y = patch_merging_forward(x, weight, gamma, beta, running_mean, running_var,
                              patch_size=patch_size2, patch_stride=patch_stride2)
    y = jax.block_until_ready(y)

    y_ref = _reference(x, weight, gamma, beta, running_mean, running_var,
                       patch_size=patch_size2, patch_stride=patch_stride2)
    assert y.shape == (N, 2 * dim, H // 2, W // 2), y.shape
    # bf16 matmul inputs -> compare to the f32 reference at bf16-level tolerance.
    max_err = float(jnp.max(jnp.abs(y - y_ref)))
    assert jnp.allclose(y, y_ref, atol=2e-2, rtol=2e-2), max_err

    print("KERNEL_OK")
</pallas_src>

<mosaic_0001>
module attributes {stable_mosaic.version = 11 : i64} {
  func.func @_patch_merge_kernel(%arg0: i32, %arg1: i32, %arg2: memref<1x16x64xbf16, #tpu.memory_space<vmem>>, %arg3: memref<8x16xbf16, #tpu.memory_space<vmem>>, %arg4: memref<8x1xf32, #tpu.memory_space<vmem>>, %arg5: memref<1x8x64xf32, #tpu.memory_space<vmem>>) attributes {dimension_semantics = [#tpu.dimension_semantics<parallel>, #tpu.dimension_semantics<parallel>], iteration_bounds = array<i64: 2, 1>, scalar_prefetch = 0 : i64, scratch_operands = 0 : i64, tpu.core_type = #tpu.core_type<tc>, window_params = [{transform_indices = @transform_0, window_bounds = array<i64: 1, 16, 64>}, {pipeline_mode = #tpu.pipeline_mode<synchronous>, transform_indices = @transform_1, window_bounds = array<i64: 8, 16>}, {pipeline_mode = #tpu.pipeline_mode<synchronous>, transform_indices = @transform_2, window_bounds = array<i64: 8, 1>}, {transform_indices = @transform_3, window_bounds = array<i64: 1, 8, 64>}]} {
    %c0 = arith.constant 0 : index
    %c0_0 = arith.constant 0 : index
    %0 = vector.load %arg3[%c0, %c0_0] : memref<8x16xbf16, #tpu.memory_space<vmem>>, vector<8x16xbf16>
    %c0_1 = arith.constant 0 : index
    %c0_2 = arith.constant 0 : index
    %c0_3 = arith.constant 0 : index
    %1 = vector.load %arg2[%c0_1, %c0_2, %c0_3] : memref<1x16x64xbf16, #tpu.memory_space<vmem>>, vector<1x16x64xbf16>
    %2 = vector.shape_cast %1 : vector<1x16x64xbf16> to vector<16x64xbf16>
    %cst = arith.constant dense<0.000000e+00> : vector<8x64xf32>
    %3 = tpu.matmul %0, %2, %cst {dimension_numbers = #tpu.dot_dimension_numbers<[1], [0], [0], [1], [0, 0, 1, 1], [], []>} : vector<8x16xbf16>, vector<16x64xbf16>, vector<8x64xf32> -> vector<8x64xf32>
    %c0_4 = arith.constant 0 : index
    %c0_5 = arith.constant 0 : index
    %4 = vector.load %arg4[%c0_4, %c0_5] : memref<8x1xf32, #tpu.memory_space<vmem>>, vector<8x1xf32>
    %5 = vector.broadcast %4 : vector<8x1xf32> to vector<8x64xf32>
    %6 = arith.addf %3, %5 : vector<8x64xf32>
    %c0_6 = arith.constant 0 : index
    %c0_7 = arith.constant 0 : index
    %c0_8 = arith.constant 0 : index
    %7 = vector.load %arg5[%c0_6, %c0_7, %c0_8] : memref<1x8x64xf32, #tpu.memory_space<vmem>>, vector<1x8x64xf32>
    %8 = vector.shape_cast %7 : vector<1x8x64xf32> to vector<8x64xf32>
    %9 = vector.shape_cast %6 : vector<8x64xf32> to vector<1x8x64xf32>
    tpu.vector_store %arg5[%c0_6, %c0_7, %c0_8], %9 {strides = array<i32>} : memref<1x8x64xf32, #tpu.memory_space<vmem>>, vector<1x8x64xf32>,
    return
  }
  func.func @transform_0(%arg0: i32, %arg1: i32) -> (i32, i32, i32) {
    %c0_i32 = arith.constant 0 : i32
    %c0_i32_0 = arith.constant 0 : i32
    return %arg0, %c0_i32, %arg1 : i32, i32, i32
  }
  func.func @transform_1(%arg0: i32, %arg1: i32) -> (i32, i32) {
    %c0_i32 = arith.constant 0 : i32
    %c0_i32_0 = arith.constant 0 : i32
    %c0_i32_1 = arith.constant 0 : i32
    return %c0_i32, %c0_i32_0 : i32, i32
  }
  func.func @transform_2(%arg0: i32, %arg1: i32) -> (i32, i32) {
    %c0_i32 = arith.constant 0 : i32
    %c0_i32_0 = arith.constant 0 : i32
    %c0_i32_1 = arith.constant 0 : i32
    return %c0_i32, %c0_i32_0 : i32, i32
  }
  func.func @transform_3(%arg0: i32, %arg1: i32) -> (i32, i32, i32) {
    %c0_i32 = arith.constant 0 : i32
    %c0_i32_0 = arith.constant 0 : i32
    return %arg0, %c0_i32, %arg1 : i32, i32, i32
  }
}

</mosaic_0001>

<bundles_post_ra>
// kernel: patch_merging_forward.1
= control target key start
LH: loop header
LB: loop body
LE: loop exit
PB: predicated region body
PF: predicated region fallthrough
CT: control target
= control target key end

     0   :  { %s400_s12 = smov 0   ;;  %s402_s13 = smov 0   ;;  %s436_s0 = inlined_call_operand.vmem [shape: bf16[2,16,64], index: 0, kind: input, shape index: {}]   ;;  %s437_s1 = inlined_call_operand.vmem [shape: bf16[8,16], index: 1, kind: input, shape index: {}]   ;;  %s438_s2 = inlined_call_operand.vmem [shape: f32[8,1], index: 2, kind: input, shape index: {}]   ;;  %s439_s3 = inlined_call_operand.vmem [shape: f32[2,8,64], index: 3, kind: output, shape index: {}]  }
   0x1   :  { %s404_s14 = smov 0  }
   0x2 LB: > { %s25_s15 = sadd.s32 1, %s373_s13  ;;  %p316_p0 = scmp.ge.s32.totalorder %s377_s14, 1  ;;  %s377_s14 = sphi %s404_s14, %s13_s14   ;;  %s373_s13 = sphi %s402_s13, %s441_s13   ;;  %s369_s12 = sphi %s400_s12, %s440_s12  }
   0x3   : > { %p27_p1 = scmp.ge.s32.totalorder %s25_s15, 2  ;;  %p156_p2 = scmp.lt.s32.totalorder %s377_s14, 3 }
   0x5   : > { %s443_s15 = smov (%p27_p1, %s25_s15), 0  ;;  %p157_p3 = pnand %p316_p0, %p156_p2 }
   0x6   : > { %p185_p4 = scmp.lt.s32.totalorder (!%p157_p3), %s369_s12, 1 }
   0x7   : > { %160 = sbr.rel (%p157_p3) target bundleno = 153 (0x99), region = 32 }
   0xc   : > { %v204_v0 = vld [vmem:[%s438_s2] sm:$0xff]  ;;  %v379_v1 = vmov 0   ;;  %s445_s12 = smov (!%p185_p4, %s369_s12), 1  ;;  %vm216_vm0 = vcmask 130048   ;;  %vm233_vm1 = vcmask 523264  }
   0xd   : > { %354 = vset.pattern.permute.xlu0 %v379_v1  ;;  %s327_s18 = sshll.u32 %s445_s12, 3  ;;  %v201_v3 = vld [vmem:[%s437_s1] sm:$0xf] }
   0xe   : > { %207 = vperm.xlu0 %354, %v204_v0   ;;  %s192_s21 = scalar_lea.vmem %s436_s0, %s327_s18  ;;  %s199_s26 = scalar_lea.vmem %s439_s3, %s327_s18 }
   0xf   : > { %v328_v2 = vld [vmem:[%s192_s21] sm:$0xff] }
  0x10   : > { %227 = vmatpush.bf16.msra.mxu0 %v328_v2 }
  0x13   : > { %324 = vmatmul.msk.bf16.vlgmr.msra.gmra.mxu0 %vm216_vm0, %v201_v3 }
  0x80   : > { %v208_v4 = vpop.permute.xlu0 %207 }
  0x90   : > { %v229_v5 = vpop.f32.mrf.mxu0 }
  0x91   : > { %v230_v6 = vadd.f32 %v229_v5, %v208_v4 }
  0x93   : > { %234 = vst.msk [vmem:[%s199_s26] sm:$0xff] %vm233_vm1, %v230_v6 }
  0x98   : > { %v231_v7 = vpop.f32.mrf.mxu0 }
  0x99 PF: > { %s13_s14 = sadd.s32 1, %s377_s14   ;;  %s440_s12 = smov %s373_s13 }
  0x9a   : > { %p10_p5 = scmp.ge.s32.totalorder %s13_s14, 4   ;;  %s441_s13 = smov %s443_s15 }
  0x9c   :  { %12 = sbr.rel (!%p10_p5) target bundleno = 2 (0x2), region = 62 }

</bundles_post_ra>
